<compile_context>
chip_gen: v5e
topology: v5e:2x2
jax: 0.10.0
libtpu: 0.0.40
codegen_flags: <defaults>
</compile_context>

<pallas_src>
import jax
import jax.numpy as jnp
from jax.experimental import pallas as pl
from jax.experimental.pallas import tpu as pltpu

PROJ_DIM = 256          # hidden size fixed by the PyTorch module
LANE = 128
NEG_SLOPE = 0.01        # nn.LeakyReLU() default negative_slope


def _round_up(x, m):
    return (x + m - 1) // m * m


def _generator_kernel(noise_ref, w1_ref, b1_ref, w2_ref, b2_ref, out_ref):
    # hidden = leaky_relu(noise @ W1 + b1); f32 MXU accumulate.
    h = jnp.dot(noise_ref[...], w1_ref[...],
                preferred_element_type=jnp.float32)
    h = h + b1_ref[...]
    h = jnp.maximum(h, NEG_SLOPE * h)           # LeakyReLU(0.01)

    # out = hidden @ W2 + b2 (fused; hidden never leaves VMEM)
    o = jnp.dot(h, w2_ref[...], preferred_element_type=jnp.float32)
    out_ref[...] = (o + b2_ref[...]).astype(out_ref.dtype)


def random_generator_forward(batch_ent_emb, params, key, *, block_b=256,
                             return_noise=False):
    """Pallas implementation of RandomGenerator.forward.

    batch_ent_emb is only used for its batch size (matching the PyTorch code).
    `params = (w1, b1, w2, b2)` in PyTorch layout transposed:
      w1 (noise_dim, 256), b1 (256,), w2 (256, img_dim), b2 (img_dim,).
    `key` replaces the implicit torch.randn RNG state.
    """
    w1, b1, w2, b2 = params
    noise_dim, proj_dim = w1.shape
    img_dim = w2.shape[1]
    assert proj_dim == PROJ_DIM

    batch = batch_ent_emb.shape[0]
    tb = min(_round_up(block_b, 8), _round_up(batch, 8))   # batch tile
    b_pad = _round_up(batch, tb)
    noise_pad = _round_up(noise_dim, LANE)    # lane-dense contraction dim
    img_pad = _round_up(img_dim, LANE)        # lane-dense output dim
    grid = (b_pad // tb,)

    # Noise drawn in the wrapper (== torch.randn in the PyTorch forward).
    noise = jax.random.normal(key, (batch, noise_dim), dtype=jnp.float32)
    noise_p = (jnp.zeros((b_pad, noise_pad), jnp.float32)
               .at[:batch, :noise_dim].set(noise))

    # Zero-pad weights/biases to lane-dense shapes; padded rows/cols are
    # zero, so padded noise lanes / output lanes never pollute valid results.
    w1_p = (jnp.zeros((noise_pad, PROJ_DIM), jnp.float32)
            .at[:noise_dim].set(w1.astype(jnp.float32)))
    b1_p = b1.astype(jnp.float32).reshape(1, PROJ_DIM)
    w2_p = (jnp.zeros((PROJ_DIM, img_pad), jnp.float32)
            .at[:, :img_dim].set(w2.astype(jnp.float32)))
    b2_p = (jnp.zeros((1, img_pad), jnp.float32)
            .at[:, :img_dim].set(b2.astype(jnp.float32).reshape(1, img_dim)))

    out_pad = pl.pallas_call(
        _generator_kernel,
        out_shape=jax.ShapeDtypeStruct((b_pad, img_pad), jnp.float32),
        grid=grid,
        in_specs=[
            # Noise: one batch tile per grid step.
            pl.BlockSpec((tb, noise_pad), lambda i: (i, 0)),
            # Weights/biases: same block every grid step -> VMEM-resident.
            pl.BlockSpec((noise_pad, PROJ_DIM), lambda i: (0, 0)),
            pl.BlockSpec((1, PROJ_DIM), lambda i: (0, 0)),
            pl.BlockSpec((PROJ_DIM, img_pad), lambda i: (0, 0)),
            pl.BlockSpec((1, img_pad), lambda i: (0, 0)),
        ],
        out_specs=pl.BlockSpec((tb, img_pad), lambda i: (i, 0)),
        compiler_params=pltpu.CompilerParams(
            dimension_semantics=("parallel",),   # shard batch tiles over TCs
        ),
    )(noise_p, w1_p, b1_p, w2_p, b2_p)

    out = out_pad[:batch, :img_dim]
    if return_noise:
        return out, noise
    return out


def init_params(key, noise_dim, img_dim):
    """Deterministic init mimicking nn.Linear default (Kaiming-uniform-ish)."""
    k1, k2, k3, k4 = jax.random.split(key, 4)
    bound1 = 1.0 / float(noise_dim) ** 0.5
    bound2 = 1.0 / float(PROJ_DIM) ** 0.5
    w1 = jax.random.uniform(k1, (noise_dim, PROJ_DIM), jnp.float32, -bound1, bound1)
    b1 = jax.random.uniform(k2, (PROJ_DIM,), jnp.float32, -bound1, bound1)
    w2 = jax.random.uniform(k3, (PROJ_DIM, img_dim), jnp.float32, -bound2, bound2)
    b2 = jax.random.uniform(k4, (img_dim,), jnp.float32, -bound2, bound2)
    return w1, b1, w2, b2


if __name__ == "__main__":
    key = jax.random.PRNGKey(0)
    k_param, k_emb, k_noise, k_big = jax.random.split(key, 4)

    batch = 2
    noise_dim = 32
    img_dim = 64

    params = init_params(k_param, noise_dim, img_dim)
    w1, b1, w2, b2 = params

    # batch_ent_emb only contributes its batch dimension, as in PyTorch.
    batch_ent_emb = jax.random.normal(k_emb, (batch, img_dim), dtype=jnp.float32)

    # Kernel call (also returns the exact noise drawn so the MLP can be
    # verified against a pure-JAX reference).
    out, noise = random_generator_forward(batch_ent_emb, params, k_noise,
                                          return_noise=True)
    out, noise = jax.block_until_ready((out, noise))

    # Pure-JAX reference of the MLP on the same noise.
    h_ref = noise @ w1 + b1
    h_ref = jnp.maximum(h_ref, NEG_SLOPE * h_ref)
    out_ref = h_ref @ w2 + b2

    assert out.shape == (batch, img_dim)
    assert bool(jnp.all(jnp.isfinite(out)))
    assert jnp.allclose(out, out_ref, atol=1e-2, rtol=1e-2), "MLP mismatch"

    # Determinism: same key -> same output.
    out2 = jax.block_until_ready(
        random_generator_forward(batch_ent_emb, params, k_noise))
    assert jnp.allclose(out, out2, atol=1e-6), "non-deterministic output"

    # Distributional sanity check of the noise (256 x 32 = 8192 samples),
    # also exercises a larger batch tile / grid.
    big_emb = jnp.zeros((256, img_dim), jnp.float32)
    out_big, big_noise = random_generator_forward(big_emb, params, k_big,
                                                  return_noise=True)
    out_big, big_noise = jax.block_until_ready((out_big, big_noise))
    assert out_big.shape == (256, img_dim)
    assert abs(float(big_noise.mean())) < 0.08, "noise mean off"
    assert 0.9 < float(big_noise.std()) < 1.1, "noise std off"

    print("KERNEL_OK")
</pallas_src>

<mosaic_0001>
module attributes {stable_mosaic.version = 11 : i64} {
  func.func @_generator_kernel(%arg0: i32, %arg1: memref<8x128xf32, #tpu.memory_space<vmem>>, %arg2: memref<128x256xf32, #tpu.memory_space<vmem>>, %arg3: memref<1x256xf32, #tpu.memory_space<vmem>>, %arg4: memref<256x128xf32, #tpu.memory_space<vmem>>, %arg5: memref<1x128xf32, #tpu.memory_space<vmem>>, %arg6: memref<8x128xf32, #tpu.memory_space<vmem>>) attributes {dimension_semantics = [#tpu.dimension_semantics<parallel>], iteration_bounds = array<i64: 1>, scalar_prefetch = 0 : i64, scratch_operands = 0 : i64, tpu.core_type = #tpu.core_type<tc>, window_params = [{transform_indices = @transform_0, window_bounds = array<i64: 8, 128>}, {pipeline_mode = #tpu.pipeline_mode<synchronous>, transform_indices = @transform_1, window_bounds = array<i64: 128, 256>}, {pipeline_mode = #tpu.pipeline_mode<synchronous>, transform_indices = @transform_2, window_bounds = array<i64: 1, 256>}, {pipeline_mode = #tpu.pipeline_mode<synchronous>, transform_indices = @transform_3, window_bounds = array<i64: 256, 128>}, {pipeline_mode = #tpu.pipeline_mode<synchronous>, transform_indices = @transform_4, window_bounds = array<i64: 1, 128>}, {transform_indices = @transform_5, window_bounds = array<i64: 8, 128>}]} {
    %c0 = arith.constant 0 : index
    %c0_0 = arith.constant 0 : index
    %0 = vector.load %arg1[%c0, %c0_0] : memref<8x128xf32, #tpu.memory_space<vmem>>, vector<8x128xf32>
    %c0_1 = arith.constant 0 : index
    %c0_2 = arith.constant 0 : index
    %1 = vector.load %arg2[%c0_1, %c0_2] : memref<128x256xf32, #tpu.memory_space<vmem>>, vector<128x256xf32>
    %cst = arith.constant dense<0.000000e+00> : vector<8x256xf32>
    %2 = tpu.matmul %0, %1, %cst {dimension_numbers = #tpu.dot_dimension_numbers<[1], [0], [0], [1], [0, 0, 1, 1], [], []>} : vector<8x128xf32>, vector<128x256xf32>, vector<8x256xf32> -> vector<8x256xf32>
    %c0_3 = arith.constant 0 : index
    %c0_4 = arith.constant 0 : index
    %3 = vector.load %arg3[%c0_3, %c0_4] : memref<1x256xf32, #tpu.memory_space<vmem>>, vector<1x256xf32>
    %4 = vector.broadcast %3 : vector<1x256xf32> to vector<8x256xf32>
    %5 = arith.addf %2, %4 : vector<8x256xf32>
    %cst_5 = arith.constant 0.00999999977 : f32
    %6 = vector.broadcast %cst_5 : f32 to vector<8x256xf32>
    %7 = arith.mulf %6, %5 : vector<8x256xf32>
    %8 = arith.maximumf %5, %7 : vector<8x256xf32>
    %c0_6 = arith.constant 0 : index
    %c0_7 = arith.constant 0 : index
    %9 = vector.load %arg4[%c0_6, %c0_7] : memref<256x128xf32, #tpu.memory_space<vmem>>, vector<256x128xf32>
    %cst_8 = arith.constant dense<0.000000e+00> : vector<8x128xf32>
    %10 = tpu.matmul %8, %9, %cst_8 {dimension_numbers = #tpu.dot_dimension_numbers<[1], [0], [0], [1], [0, 0, 1, 1], [], []>} : vector<8x256xf32>, vector<256x128xf32>, vector<8x128xf32> -> vector<8x128xf32>
    %c0_9 = arith.constant 0 : index
    %c0_10 = arith.constant 0 : index
    %11 = vector.load %arg5[%c0_9, %c0_10] : memref<1x128xf32, #tpu.memory_space<vmem>>, vector<1x128xf32>
    %12 = vector.broadcast %11 : vector<1x128xf32> to vector<8x128xf32>
    %13 = arith.addf %10, %12 : vector<8x128xf32>
    %c0_11 = arith.constant 0 : index
    %c0_12 = arith.constant 0 : index
    %14 = vector.load %arg6[%c0_11, %c0_12] : memref<8x128xf32, #tpu.memory_space<vmem>>, vector<8x128xf32>
    tpu.vector_store %arg6[%c0_11, %c0_12], %13 {strides = array<i32>} : memref<8x128xf32, #tpu.memory_space<vmem>>, vector<8x128xf32>,
    return
  }
  func.func @transform_0(%arg0: i32) -> (i32, i32) {
    %c0_i32 = arith.constant 0 : i32
    %c0_i32_0 = arith.constant 0 : i32
    return %arg0, %c0_i32 : i32, i32
  }
  func.func @transform_1(%arg0: i32) -> (i32, i32) {
    %c0_i32 = arith.constant 0 : i32
    %c0_i32_0 = arith.constant 0 : i32
    %c0_i32_1 = arith.constant 0 : i32
    return %c0_i32, %c0_i32_0 : i32, i32
  }
  func.func @transform_2(%arg0: i32) -> (i32, i32) {
    %c0_i32 = arith.constant 0 : i32
    %c0_i32_0 = arith.constant 0 : i32
    %c0_i32_1 = arith.constant 0 : i32
    return %c0_i32, %c0_i32_0 : i32, i32
  }
  func.func @transform_3(%arg0: i32) -> (i32, i32) {
    %c0_i32 = arith.constant 0 : i32
    %c0_i32_0 = arith.constant 0 : i32
    %c0_i32_1 = arith.constant 0 : i32
    return %c0_i32, %c0_i32_0 : i32, i32
  }
  func.func @transform_4(%arg0: i32) -> (i32, i32) {
    %c0_i32 = arith.constant 0 : i32
    %c0_i32_0 = arith.constant 0 : i32
    %c0_i32_1 = arith.constant 0 : i32
    return %c0_i32, %c0_i32_0 : i32, i32
  }
  func.func @transform_5(%arg0: i32) -> (i32, i32) {
    %c0_i32 = arith.constant 0 : i32
    %c0_i32_0 = arith.constant 0 : i32
    return %arg0, %c0_i32 : i32, i32
  }
}

</mosaic_0001>

<bundles_post_ra>
// kernel: tpu_custom_call.1
= control target key start
LH: loop header
LB: loop body
LE: loop exit
PB: predicated region body
PF: predicated region fallthrough
CT: control target
= control target key end

     0   :  { %10 = vsyncpa [#allocation3], 0  ;;  %s454_s0 = inlined_call_operand.hbm [shape: f32[8,128], index: 0, kind: input, shape index: {}]   ;;  %s455_s1 = inlined_call_operand.hbm [shape: f32[128,256], index: 1, kind: input, shape index: {}]   ;;  %s456_s2 = inlined_call_operand.hbm [shape: f32[1,256], index: 2, kind: input, shape index: {}]   ;;  %s457_s3 = inlined_call_operand.hbm [shape: f32[256,128], index: 3, kind: input, shape index: {}]   ;;  %s458_s4 = inlined_call_operand.vmem [shape: f32[1,128], index: 4, kind: input, shape index: {}]   ;;  %s459_s5 = inlined_call_operand.hbm [shape: f32[8,128], index: 5, kind: output, shape index: {}]  }
   0x1   :  { %11 = vsyncpa [#allocation6], 0 }
   0x2   :  { %12 = vsyncpa [#allocation9], 0  ;;  %s29_s20 = sshll.u32 %s455_s1, 4  ;;  %s30_s20 = int_to_ptr.hbm [resolvable:$true] %s29_s20 }
   0x3   :  { %13 = vsyncpa [#allocation4], 0  ;;  %s397_s21 = smov [#allocation5]   ;;  %s19_s25 = sshll.u32 %s454_s0, 4  ;;  %s20_s25 = int_to_ptr.hbm [resolvable:$true] %s19_s25 }
   0x4   :  { %s31_s22 = sshll.u32 %s397_s21, 4  ;;  %s398_s26 = smov 256   ;;  %s32_s22 = int_to_ptr.vmem [resolvable:$true] %s31_s22 }
   0x5   :  { %s399_s27 = smov 16   ;;  %s400_s28 = smov [#allocation2]  }
   0x6   :  { %37 = dma.hbm_to_vmem [thread:$0]  %s30_s20, 4096, %s32_s22, [#allocation6], %s398_s26, %s398_s26, %s399_s27  }
   0x7   :  { %s21_s29 = sshll.u32 %s400_s28, 4  ;;  %s43_s7 = sshll.u32 %s456_s2, 4  ;;  %s22_s29 = int_to_ptr.vmem [resolvable:$true] %s21_s29  ;;  %s44_s7 = int_to_ptr.hbm [resolvable:$true] %s43_s7 }
   0x8   :  { %24 = dma.hbm_to_vmem [thread:$0]  %s20_s25, 128, %s22_s29, [#allocation3]  }
   0x9   :  { %s53_s9 = sshll.u32 %s457_s3, 4  ;;  %s401_s10 = smov [#allocation7]   ;;  %s54_s9 = int_to_ptr.hbm [resolvable:$true] %s53_s9 }
   0xa   :  { %s45_s11 = sshll.u32 %s401_s10, 4  ;;  %s402_s0 = smov [#allocation8]   ;;  %s46_s11 = int_to_ptr.vmem [resolvable:$true] %s45_s11 }
   0xb   :  { %48 = dma.hbm_to_vmem [thread:$0]  %s44_s7, 32, %s46_s11, [#allocation6]  }
   0xc   :  { %s55_s12 = sshll.u32 %s402_s0, 4  ;;  %s403_s13 = smov 128   ;;  %s56_s12 = int_to_ptr.vmem [resolvable:$true] %s55_s12 }
   0xd   :  { %s404_s14 = smov 8  }
   0xe   :  { %61 = dma.hbm_to_vmem [thread:$0]  %s54_s9, 4096, %s56_s12, [#allocation9], %s403_s13, %s403_s13, %s404_s14  }
   0xf   :  { %389 = dma.done.wait [#allocation3], 128  }
  0x10   :  { %390 = vsyncadd [#allocation3], 4294967168 }
  0x11   :  { %391 = dma.done.wait [#allocation6], 4128  }
  0x12   :  { %392 = vsyncadd [#allocation6], 4294963168 }
  0x13   :  { %393 = dma.done.wait [#allocation9], 4096  }
  0x14   :  { %394 = vsyncadd [#allocation9], 4294963200  ;;  %v111_v0 = vld [vmem:[#allocation5 + $0xf0] sm:$0xff]  ;;  %v112_v1 = vld [vmem:[#allocation5 + $0xf8] sm:$0xff]  ;;  %s405_s15 = smov [#allocation10]   ;;  %s247_s19 = sshll.u32 %s459_s5, 4  ;;  %s248_s19 = int_to_ptr.hbm [resolvable:$true] %s247_s19 }
  0x15   :  { %v109_v2 = vld [vmem:[#allocation5 + $0xe0] sm:$0xff]  ;;  %119 = vmatpush.msra.mxu0 %v111_v0  ;;  %139 = vmatpush.msra.mxu1 %v112_v1  ;;  %v110_v3 = vld [vmem:[#allocation5 + $0xe8] sm:$0xff]  ;;  %v107_v4 = vld [vmem:[#allocation5 + $0xd0] sm:$0xff]  ;;  %s245_s16 = sshll.u32 %s405_s15, 4  ;;  %s246_s16 = int_to_ptr.vmem [resolvable:$true] %s245_s16 }
  0x16   :  { %v108_v5 = vld [vmem:[#allocation5 + $0xd8] sm:$0xff]  ;;  %v105_v6 = vld [vmem:[#allocation5 + $0xc0] sm:$0xff]  ;;  %v106_v7 = vld [vmem:[#allocation5 + $0xc8] sm:$0xff] }
  0x17   :  { %120 = vmatpush.msra.mxu0 %v109_v2  ;;  %140 = vmatpush.msra.mxu1 %v110_v3  ;;  %v103_v8 = vld [vmem:[#allocation5 + $0xb0] sm:$0xff]  ;;  %v104_v9 = vld [vmem:[#allocation5 + $0xb8] sm:$0xff]  ;;  %v101_v10 = vld [vmem:[#allocation5 + $0xa0] sm:$0xff] }
  0x18   :  { %v102_v11 = vld [vmem:[#allocation5 + $0xa8] sm:$0xff]  ;;  %v99_v12 = vld [vmem:[#allocation5 + $0x90] sm:$0xff]  ;;  %v100_v13 = vld [vmem:[#allocation5 + $0x98] sm:$0xff] }
  0x19   :  { %121 = vmatpush.msra.mxu0 %v107_v4  ;;  %141 = vmatpush.msra.mxu1 %v108_v5  ;;  %v178_v14 = vld [vmem:[#allocation8 + $0x78] sm:$0xff]  ;;  %v177_v16 = vld [vmem:[#allocation8 + $0x70] sm:$0xff]  ;;  %v98_v18 = vld [vmem:[#allocation5 + $0x88] sm:$0xff] }
  0x1a   :  { %v194_v15 = vld [vmem:[#allocation8 + $0xf8] sm:$0xff]  ;;  %199 = vmatpush.msra.mxu2 %v178_v14  ;;  %v193_v19 = vld [vmem:[#allocation8 + $0xf0] sm:$0xff]  ;;  %v176_v20 = vld [vmem:[#allocation8 + $0x68] sm:$0xff] }
  0x1b   :  { %122 = vmatpush.msra.mxu0 %v105_v6  ;;  %142 = vmatpush.msra.mxu1 %v106_v7  ;;  %v97_v17 = vld [vmem:[#allocation5 + $0x80] sm:$0xff]  ;;  %v192_v21 = vld [vmem:[#allocation8 + $0xe8] sm:$0xff]  ;;  %v96_v23 = vld [vmem:[#allocation5 + $0x78] sm:$0xff] }
  0x1c   :  { %219 = vmatpush.msra.mxu3 %v194_v15  ;;  %v95_v22 = vld [vmem:[#allocation5 + $0x70] sm:$0xff]  ;;  %200 = vmatpush.msra.mxu2 %v177_v16  ;;  %v175_v24 = vld [vmem:[#allocation8 + $0x60] sm:$0xff]  ;;  %v174_v28 = vld [vmem:[#allocation8 + $0x58] sm:$0xff] }
  0x1d   :  { %123 = vmatpush.msra.mxu0 %v103_v8  ;;  %143 = vmatpush.msra.mxu1 %v104_v9  ;;  %v191_v25 = vld [vmem:[#allocation8 + $0xe0] sm:$0xff]  ;;  %v190_v29 = vld [vmem:[#allocation8 + $0xd8] sm:$0xff]  ;;  %v91_v30 = vld [vmem:[#allocation5 + $0x50] sm:$0xff] }
  0x1e   :  { %220 = vmatpush.msra.mxu3 %v193_v19  ;;  %v93_v26 = vld [vmem:[#allocation5 + $0x60] sm:$0xff]  ;;  %v94_v27 = vld [vmem:[#allocation5 + $0x68] sm:$0xff]  ;;  %201 = vmatpush.msra.mxu2 %v176_v20  ;;  %v92_v31 = vld [vmem:[#allocation5 + $0x58] sm:$0xff] }
  0x1f   :  { %124 = vmatpush.msra.mxu0 %v101_v10  ;;  %144 = vmatpush.msra.mxu1 %v102_v11  ;;  %v173_v32 = vld [vmem:[#allocation8 + $0x50] sm:$0xff]  ;;  %v89_v34 = vld [vmem:[#allocation5 + $0x40] sm:$0xff]  ;;  %v90_v35 = vld [vmem:[#allocation5 + $0x48] sm:$0xff] }
  0x20   :  { %221 = vmatpush.msra.mxu3 %v192_v21  ;;  %202 = vmatpush.msra.mxu2 %v175_v24  ;;  %v189_v33 = vld [vmem:[#allocation8 + $0xd0] sm:$0xff]  ;;  %v172_v36 = vld [vmem:[#allocation8 + $0x48] sm:$0xff]  ;;  %v171_v40 = vld [vmem:[#allocation8 + $0x40] sm:$0xff] }
  0x21   :  { %125 = vmatpush.msra.mxu0 %v99_v12  ;;  %145 = vmatpush.msra.mxu1 %v100_v13  ;;  %v188_v37 = vld [vmem:[#allocation8 + $0xc8] sm:$0xff]  ;;  %v88_v39 = vld [vmem:[#allocation5 + $0x38] sm:$0xff]  ;;  %v187_v41 = vld [vmem:[#allocation8 + $0xc0] sm:$0xff] }
  0x22   :  { %222 = vmatpush.msra.mxu3 %v191_v25  ;;  %203 = vmatpush.msra.mxu2 %v174_v28  ;;  %v87_v38 = vld [vmem:[#allocation5 + $0x30] sm:$0xff]  ;;  %v85_v42 = vld [vmem:[#allocation5 + $0x20] sm:$0xff]  ;;  %v86_v43 = vld [vmem:[#allocation5 + $0x28] sm:$0xff] }
  0x23   :  { %126 = vmatpush.msra.mxu0 %v97_v17  ;;  %146 = vmatpush.msra.mxu1 %v98_v18  ;;  %v170_v44 = vld [vmem:[#allocation8 + $0x38] sm:$0xff]  ;;  %v83_v46 = vld [vmem:[#allocation5 + $0x10] sm:$0xff]  ;;  %v82_v51 = vld [vmem:[#allocation5 + $0x8] sm:$0xff] }
  0x24   :  { %223 = vmatpush.msra.mxu3 %v190_v29  ;;  %204 = vmatpush.msra.mxu2 %v173_v32  ;;  %v186_v45 = vld [vmem:[#allocation8 + $0xb8] sm:$0xff]  ;;  %v169_v48 = vld [vmem:[#allocation8 + $0x30] sm:$0xff]  ;;  %v168_v53 = vld [vmem:[#allocation8 + $0x28] sm:$0xff] }
  0x25   :  { %127 = vmatpush.msra.mxu0 %v95_v22  ;;  %147 = vmatpush.msra.mxu1 %v96_v23  ;;  %v84_v47 = vld [vmem:[#allocation5 + $0x18] sm:$0xff]  ;;  %v81_v50 = vld [vmem:[#allocation5] sm:$0xff]  ;;  %v184_v54 = vld [vmem:[#allocation8 + $0xa8] sm:$0xff] }
  0x26   :  { %224 = vmatpush.msra.mxu3 %v189_v33  ;;  %205 = vmatpush.msra.mxu2 %v172_v36  ;;  %v185_v49 = vld [vmem:[#allocation8 + $0xb0] sm:$0xff]  ;;  %v167_v55 = vld [vmem:[#allocation8 + $0x20] sm:$0xff]  ;;  %v166_v57 = vld [vmem:[#allocation8 + $0x18] sm:$0xff] }
  0x27   :  { %128 = vmatpush.msra.mxu0 %v93_v26  ;;  %148 = vmatpush.msra.mxu1 %v94_v27  ;;  %v80_v52 = vld [vmem:[#allocation2] sm:$0xff]  ;;  %v183_v56 = vld [vmem:[#allocation8 + $0xa0] sm:$0xff]  ;;  %v164_v61 = vld [vmem:[#allocation8 + $0x8] sm:$0xff] }
  0x28   :  { %225 = vmatpush.msra.mxu3 %v188_v37  ;;  %206 = vmatpush.msra.mxu2 %v171_v40  ;;  %v182_v58 = vld [vmem:[#allocation8 + $0x98] sm:$0xff]  ;;  %v165_v59 = vld [vmem:[#allocation8 + $0x10] sm:$0xff]  ;;  %v180_v62 = vld [vmem:[#allocation8 + $0x88] sm:$0xff] }
  0x29   :  { %129 = vmatpush.msra.mxu0 %v91_v30  ;;  %149 = vmatpush.msra.mxu1 %v92_v31  ;;  %v181_v60 = vld [vmem:[#allocation8 + $0x90] sm:$0xff]  ;;  %v163_v63 = vld [vmem:[#allocation8] sm:$0xff]  ;;  %v113_v1 = vld [vmem:[#allocation7] sm:$0x3] }
  0x2a   :  { %226 = vmatpush.msra.mxu3 %v187_v41  ;;  %207 = vmatpush.msra.mxu2 %v170_v44  ;;  %v179_v0 = vld [vmem:[#allocation8 + $0x80] sm:$0xff]  ;;  %v115_v2 = vperm.slane %v113_v1, 0  ;;  %v116_v3 = vperm.slane %v113_v1, 1  ;;  %v268_v12 = vld [vmem:[%s458_s4] ss:$0 sm:$0xff] }
  0x2b   :  { %130 = vmatpush.msra.mxu0 %v89_v34  ;;  %150 = vmatpush.msra.mxu1 %v90_v35 }
  0x2c   :  { %227 = vmatpush.msra.mxu3 %v186_v45  ;;  %208 = vmatpush.msra.mxu2 %v169_v48 }
  0x2d   :  { %131 = vmatpush.msra.mxu0 %v87_v38  ;;  %151 = vmatpush.msra.mxu1 %v88_v39 }
  0x2e   :  { %228 = vmatpush.msra.mxu3 %v185_v49  ;;  %209 = vmatpush.msra.mxu2 %v168_v53 }
  0x2f   :  { %132 = vmatpush.msra.mxu0 %v85_v42  ;;  %152 = vmatpush.msra.mxu1 %v86_v43 }
  0x30   :  { %229 = vmatpush.msra.mxu3 %v184_v54  ;;  %210 = vmatpush.msra.mxu2 %v167_v55 }
  0x31   :  { %133 = vmatpush.msra.mxu0 %v83_v46  ;;  %153 = vmatpush.msra.mxu1 %v84_v47 }
  0x32   :  { %230 = vmatpush.msra.mxu3 %v183_v56  ;;  %211 = vmatpush.msra.mxu2 %v166_v57 }
  0x33   :  { %134 = vmatpush.msra.mxu0 %v81_v50  ;;  %154 = vmatpush.msra.mxu1 %v82_v51 }
  0x34   :  { %135 = vmatmul.f32.vlgmr.msra.gmra.mxu0 %v80_v52  ;;  %155 = vmatmul.f32.vlgmr.msra.gmra.mxu1 %v80_v52 }
  0x35   :  { %231 = vmatpush.msra.mxu3 %v182_v58  ;;  %212 = vmatpush.msra.mxu2 %v165_v59 }
  0x37   :  { %232 = vmatpush.msra.mxu3 %v181_v60  ;;  %213 = vmatpush.msra.mxu2 %v164_v61 }
  0x39   :  { %233 = vmatpush.msra.mxu3 %v180_v62  ;;  %214 = vmatpush.msra.mxu2 %v163_v63 }
  0x3b   :  { %234 = vmatpush.msra.mxu3 %v179_v0 }
  0xb1   :  { %v136_v4 = vpop.f32.mrf.mxu0  ;;  %v156_v5 = vpop.f32.mrf.mxu1 }
  0xb2   :  { %v137_v6 = vadd.f32 %v136_v4, %v115_v2  ;;  %v157_v7 = vadd.f32 %v156_v5, %v116_v3 }
  0xb4   :  { %v159_v8 = vmul.f32 0.01, %v137_v6  ;;  %v160_v9 = vmul.f32 0.01, %v157_v7 }
  0xb6   :  { %v161_v10 = vmax.f32 %v137_v6, %v159_v8  ;;  %v162_v11 = vmax.f32 %v157_v7, %v160_v9 }
  0xb8   :  { %215 = vmatmul.f32.vlgmr.msra.gmra.mxu2 %v161_v10  ;;  %235 = vmatmul.f32.vlgmr.msra.gmra.mxu3 %v162_v11 }
 0x13b   :  { %v216_v13 = vpop.f32.mrf.mxu2  ;;  %v236_v15 = vpop.f32.mrf.mxu3 }
 0x13c   :  { %v217_v14 = vadd.f32 %v268_v12, %v216_v13 }
 0x13e   :  { %v237_v16 = vadd.f32 %v236_v15, %v217_v14 }
 0x140   :  { %239 = vst [vmem:[#allocation10] sm:$0xff] %v237_v16 }
 0x141   :  { %250 = dma.vmem_to_hbm [thread:$0]  %s246_s16, 128, %s248_s19, [#allocation4]  }
 0x142   :  { %395 = dma.done.wait [#allocation4], 128  }
 0x143   :  { %396 = vsyncadd [#allocation4], 4294967168 }
 0x144   :  { %255 = vsyncpa [#allocation3], 1 }
 0x145   :  { %256 = vsyncpa [#allocation6], 1 }
 0x146   :  { %257 = vsyncpa [#allocation9], 1 }
 0x147   :  { %258 = vsyncpa [#allocation4], 1 }

</bundles_post_ra>
